<compile_context>
chip_gen: v7x
topology: tpu7x:2x2x1
jax: 0.10.0
libtpu: 0.0.40
codegen_flags: <defaults>
</compile_context>

<pallas_src>
import functools
import math

import numpy as np
import jax
import jax.numpy as jnp
from jax.experimental import pallas as pl
from jax.experimental.pallas import tpu as pltpu


NUM_CLASSES = 10   # robust-model classes
DET_CLASSES = 2    # detector output: [p_original, p_backdoor]
LANE = 128         # padded lane width for weights / output


def _round_up(x, m):
    return (x + m - 1) // m * m


# ----------------------------- fused Pallas kernel -----------------------------

def _backdoor_kernel(img_ref, w_ref, b_ref, perm_ref, out_ref, *,
                     num_classes, k_pad, target_class):
    """One batch tile of the fused ModelWithSmallBackdoor forward.

    img_ref  : (TILE_N, F_img)  bf16 flattened image tile (streamed)
    w_ref    : (F_img, K_PAD)   bf16 fused [robust | detector | zero-pad] weights
    b_ref    : (1, K_PAD)       f32 fused bias
    perm_ref : (K_PAD, K_PAD)   f32 cyclic roll permutation (trace-time constant)
    out_ref  : (TILE_N, K_PAD)  f32 lane-dense backdoored probabilities
    """
    # Single whole-tile MXU matmul, bf16 operands, f32 accumulation.
    logits = jnp.dot(img_ref[...], w_ref[...],
                     preferred_element_type=jnp.float32) + b_ref[...]

    col = jax.lax.broadcasted_iota(jnp.int32, (1, k_pad), 1)
    neg = jnp.float32(-1e30)

    # ---- robust-model softmax over the first `num_classes` lanes only --------
    logits_r = jnp.where(col < num_classes, logits, neg)
    m_r = jnp.max(logits_r, axis=-1, keepdims=True)
    e_r = jnp.exp(logits_r - m_r)
    p_robust = e_r * pl.reciprocal(jnp.sum(e_r, axis=-1, keepdims=True),
                                   approx=True)                    # padded lanes == 0

    # ---- detector 2-way softmax from lanes [K, K+1] ---------------------------
    ld = logits[:, num_classes:num_classes + DET_CLASSES]           # (TILE_N, 2)
    m_d = jnp.max(ld, axis=-1, keepdims=True)
    e_d = jnp.exp(ld - m_d)
    p_det = e_d * pl.reciprocal(jnp.sum(e_d, axis=-1, keepdims=True), approx=True)
    p_original = p_det[:, 0:1]    # prediction[:, 0].unsqueeze(1)
    p_backdoor = p_det[:, 1:2]    # prediction[:, 1].unsqueeze(1)

    if target_class < 0:
        # torch.roll(p_robust, 1, dims=1) over the K valid classes, via a
        # trace-time constant permutation matrix (padded lanes stay zero).
        rolled = jnp.dot(p_robust, perm_ref[...],
                         preferred_element_type=jnp.float32)
        soft_backdoor = rolled * p_backdoor
    else:
        tc = 0 if target_class >= num_classes else target_class
        onehot = (col == tc).astype(jnp.float32)
        soft_backdoor = onehot * p_backdoor

    out_ref[...] = p_robust * p_original + soft_backdoor


# ----------------------------- wrapper ------------------------------------------

def fuse_params(params, *, c, h, w, position, size,
                num_classes=NUM_CLASSES, k_pad=LANE):
    """One-time param prep: scatter detector weights into full-image feature
    space, concat with robust weights, lane-pad to 128, build roll perm."""
    f_img = c * h * w
    py, px = position
    sh, sw = size

    w_robust = np.asarray(params["w_robust"], np.float32)            # (F_img, K)
    b_robust = np.asarray(params["b_robust"], np.float32).reshape(-1)
    w_det = np.asarray(params["w_det"], np.float32)                  # (F_patch, 2)
    b_det = np.asarray(params["b_det"], np.float32).reshape(-1)

    w_full = np.zeros((f_img, k_pad), np.float32)
    w_full[:, :num_classes] = w_robust
    # Flattened-image indices of the patch features (NCHW row-major), in the
    # same order as patch.reshape(N, -1): c-major, then dy, then dx.
    cc, yy, xx = np.meshgrid(np.arange(c), np.arange(sh), np.arange(sw),
                             indexing="ij")
    flat_idx = (cc * h * w + (py + yy) * w + (px + xx)).reshape(-1)
    w_full[flat_idx, num_classes:num_classes + DET_CLASSES] = w_det

    b_full = np.zeros((1, k_pad), np.float32)
    b_full[0, :num_classes] = b_robust
    b_full[0, num_classes:num_classes + DET_CLASSES] = b_det

    # Cyclic permutation restricted to the K valid classes:
    # rolled[:, j] = p[:, (j - 1) mod K] for j < K, zero elsewhere.
    perm = np.zeros((k_pad, k_pad), np.float32)
    for j in range(num_classes):
        perm[(j - 1) % num_classes, j] = 1.0

    return (jnp.asarray(w_full, jnp.bfloat16),
            jnp.asarray(b_full, jnp.float32),
            jnp.asarray(perm, jnp.float32))


def model_with_small_backdoor(image, fused, *, num_classes=NUM_CLASSES,
                              target_class=-1, tile_n=512, k_pad=LANE):
    """image: (N, C, H, W) float32 (NCHW, PyTorch convention)."""
    w_full, b_full, perm = fused
    n, c, h, w = image.shape
    f_img = c * h * w

    img_flat = image.reshape(n, f_img).astype(jnp.bfloat16)

    # Batch tiling: stream TILE_N rows per grid step; pad batch to a multiple.
    tile_n = min(tile_n, _round_up(n, 8))
    n_pad = _round_up(n, tile_n)
    if n_pad != n:
        img_flat = jnp.pad(img_flat, ((0, n_pad - n), (0, 0)))
    grid = (n_pad // tile_n,)

    kern = functools.partial(_backdoor_kernel, num_classes=num_classes,
                             k_pad=k_pad, target_class=target_class)

    flops = 2 * n_pad * f_img * k_pad + 2 * n_pad * k_pad * k_pad
    bytes_accessed = (2 * n_pad * f_img            # bf16 image
                      + 2 * f_img * k_pad          # bf16 fused weights
                      + 4 * k_pad                  # bias
                      + 4 * k_pad * k_pad          # perm
                      + 4 * n_pad * k_pad)         # f32 output

    out = pl.pallas_call(
        kern,
        out_shape=jax.ShapeDtypeStruct((n_pad, k_pad), jnp.float32),
        grid=grid,
        in_specs=[
            pl.BlockSpec((tile_n, f_img), lambda i: (i, 0)),      # streamed image tile
            pl.BlockSpec((f_img, k_pad), lambda i: (0, 0)),       # resident weights
            pl.BlockSpec((1, k_pad), lambda i: (0, 0)),           # resident bias
            pl.BlockSpec((k_pad, k_pad), lambda i: (0, 0)),       # resident roll perm
        ],
        out_specs=pl.BlockSpec((tile_n, k_pad), lambda i: (i, 0)),  # lane-dense store
        compiler_params=pltpu.CompilerParams(
            dimension_semantics=("parallel",),
            vmem_limit_bytes=32 * 1024 * 1024),
        cost_estimate=pl.CostEstimate(
            flops=flops,
            transcendentals=n_pad * (k_pad + DET_CLASSES + 2),
            bytes_accessed=bytes_accessed),
    )(img_flat, w_full, b_full, perm)

    return out[:n, :num_classes]


# ----------------------------- parameters & reference ---------------------------

def init_params(key, *, c, h, w, patch_h, patch_w, num_classes):
    """PyTorch-Linear-style init (uniform +/- 1/sqrt(fan_in))."""
    f_img = c * h * w
    f_patch = c * patch_h * patch_w
    k1, k2, k3, k4 = jax.random.split(key, 4)
    b_r = 1.0 / math.sqrt(f_img)
    b_d = 1.0 / math.sqrt(f_patch)
    return {
        "w_robust": jax.random.uniform(k1, (f_img, num_classes), jnp.float32, -b_r, b_r),
        "b_robust": jax.random.uniform(k2, (1, num_classes), jnp.float32, -b_r, b_r),
        "w_det":    jax.random.uniform(k3, (f_patch, DET_CLASSES), jnp.float32, -b_d, b_d),
        "b_det":    jax.random.uniform(k4, (1, DET_CLASSES), jnp.float32, -b_d, b_d),
    }


def _reference(image, params, *, position, size, target_class=-1):
    """Pure-JAX f32 reference mirroring ModelWithSmallBackdoor.forward."""
    n, c, h, w = image.shape
    (py, px), (sh, sw) = position, size
    patch = image[:, :, py:py + sh, px:px + sw]
    img_flat = image.reshape(n, -1)
    patch_flat = patch.reshape(n, -1)

    hi = jax.lax.Precision.HIGHEST
    logits_r = jnp.dot(img_flat, params["w_robust"], precision=hi) + params["b_robust"]
    p_robust = jax.nn.softmax(logits_r, axis=-1)
    logits_d = jnp.dot(patch_flat, params["w_det"], precision=hi) + params["b_det"]
    p_det = jax.nn.softmax(logits_d, axis=-1)

    p_original = p_det[:, 0:1]
    p_backdoor = p_det[:, 1:2]
    k = p_robust.shape[1]
    if target_class < 0:
        soft_backdoor = jnp.roll(p_robust, 1, axis=1) * p_backdoor
    else:
        tc = 0 if target_class >= k else target_class
        soft_backdoor = jax.nn.one_hot(tc, k, dtype=jnp.float32)[None, :] * p_backdoor
    return p_robust * p_original + soft_backdoor


# ----------------------------- demo / smoke test --------------------------------

if __name__ == "__main__":
    N, C, H, W = 2, 4, 16, 16
    PATCH_POS = (4, 4)    # position_of_backdoor
    PATCH_SIZE = (8, 8)   # size_of_backdoor

    key = jax.random.PRNGKey(0)
    pkey, ikey = jax.random.split(key)
    params = init_params(pkey, c=C, h=H, w=W,
                         patch_h=PATCH_SIZE[0], patch_w=PATCH_SIZE[1],
                         num_classes=NUM_CLASSES)
    image = jax.random.normal(ikey, (N, C, H, W), jnp.float32)

    fused = fuse_params(params, c=C, h=H, w=W,
                        position=PATCH_POS, size=PATCH_SIZE)

    # Default path: roll-based backdoor mixing.
    out = model_with_small_backdoor(image, fused, target_class=-1)
    out = jax.block_until_ready(out)
    assert out.shape == (N, NUM_CLASSES), out.shape
    assert bool(jnp.all(jnp.isfinite(out)))
    ref = _reference(image, params, position=PATCH_POS, size=PATCH_SIZE,
                     target_class=-1)
    assert bool(jnp.allclose(out, ref, atol=1e-2, rtol=1e-2)), \
        float(jnp.max(jnp.abs(out - ref)))

    # Targeted-class path.
    out_t = model_with_small_backdoor(image, fused, target_class=3)
    out_t = jax.block_until_ready(out_t)
    ref_t = _reference(image, params, position=PATCH_POS, size=PATCH_SIZE,
                       target_class=3)
    assert bool(jnp.allclose(out_t, ref_t, atol=1e-2, rtol=1e-2)), \
        float(jnp.max(jnp.abs(out_t - ref_t)))

    print("KERNEL_OK")
</pallas_src>

<mosaic_0001>
module attributes {stable_mosaic.version = 11 : i64} {
  func.func @_backdoor_kernel(%arg0: i32, %arg1: memref<8x1024xbf16, #tpu.memory_space<vmem>>, %arg2: memref<1024x128xbf16, #tpu.memory_space<vmem>>, %arg3: memref<1x128xf32, #tpu.memory_space<vmem>>, %arg4: memref<128x128xf32, #tpu.memory_space<vmem>>, %arg5: memref<8x128xf32, #tpu.memory_space<vmem>>) attributes {dimension_semantics = [#tpu.dimension_semantics<parallel>], iteration_bounds = array<i64: 1>, scalar_prefetch = 0 : i64, scratch_operands = 0 : i64, tpu.core_type = #tpu.core_type<tc>, window_params = [{transform_indices = @transform_0, window_bounds = array<i64: 8, 1024>}, {pipeline_mode = #tpu.pipeline_mode<synchronous>, transform_indices = @transform_1, window_bounds = array<i64: 1024, 128>}, {pipeline_mode = #tpu.pipeline_mode<synchronous>, transform_indices = @transform_2, window_bounds = array<i64: 1, 128>}, {pipeline_mode = #tpu.pipeline_mode<synchronous>, transform_indices = @transform_3, window_bounds = array<i64: 128, 128>}, {transform_indices = @transform_4, window_bounds = array<i64: 8, 128>}]} {
    %c0 = arith.constant 0 : index
    %c0_0 = arith.constant 0 : index
    %0 = vector.load %arg1[%c0, %c0_0] : memref<8x1024xbf16, #tpu.memory_space<vmem>>, vector<8x1024xbf16>
    %c0_1 = arith.constant 0 : index
    %c0_2 = arith.constant 0 : index
    %1 = vector.load %arg2[%c0_1, %c0_2] : memref<1024x128xbf16, #tpu.memory_space<vmem>>, vector<1024x128xbf16>
    %cst = arith.constant dense<0.000000e+00> : vector<8x128xf32>
    %2 = tpu.matmul %0, %1, %cst {dimension_numbers = #tpu.dot_dimension_numbers<[1], [0], [0], [1], [0, 0, 1, 1], [], []>} : vector<8x1024xbf16>, vector<1024x128xbf16>, vector<8x128xf32> -> vector<8x128xf32>
    %c0_3 = arith.constant 0 : index
    %c0_4 = arith.constant 0 : index
    %3 = vector.load %arg3[%c0_3, %c0_4] : memref<1x128xf32, #tpu.memory_space<vmem>>, vector<1x128xf32>
    %4 = vector.broadcast %3 : vector<1x128xf32> to vector<8x128xf32>
    %5 = arith.addf %2, %4 : vector<8x128xf32>
    %6 = tpu.iota {dimensions = array<i32: 1>} : vector<1x128xi32>
    %c10_i32 = arith.constant 10 : i32
    %7 = vector.broadcast %c10_i32 : i32 to vector<1x128xi32>
    %8 = arith.cmpi slt, %6, %7 : vector<1x128xi32>
    %cst_5 = arith.constant -1.000000e+30 : f32
    %9 = vector.shape_cast %8 : vector<1x128xi1> to vector<1x128xi1>
    %10 = vector.broadcast %9 : vector<1x128xi1> to vector<8x128xi1>
    %11 = vector.broadcast %cst_5 : f32 to vector<8x128xf32>
    %12 = arith.select %10, %5, %11 : vector<8x128xi1>, vector<8x128xf32>
    %cst_6 = arith.constant dense<0xFF800000> : vector<8xf32>
    %13 = vector.multi_reduction <maximumf>, %12, %cst_6 [1] : vector<8x128xf32> to vector<8xf32>
    %14 = vector.shape_cast %13 : vector<8xf32> to vector<8x1xf32>
    %15 = vector.broadcast %14 : vector<8x1xf32> to vector<8x128xf32>
    %16 = arith.subf %12, %15 : vector<8x128xf32>
    %17 = math.exp %16 : vector<8x128xf32>
    %cst_7 = arith.constant dense<0.000000e+00> : vector<8xf32>
    %18 = vector.multi_reduction <add>, %17, %cst_7 [1] : vector<8x128xf32> to vector<8xf32>
    %19 = vector.shape_cast %18 : vector<8xf32> to vector<8x1xf32>
    %20 = tpu.reciprocal %19 {approx = true} : vector<8x1xf32> -> vector<8x1xf32>
    %21 = vector.broadcast %20 : vector<8x1xf32> to vector<8x128xf32>
    %22 = arith.mulf %17, %21 : vector<8x128xf32>
    %23 = vector.extract_strided_slice %5 {offsets = [0, 10], sizes = [8, 2], strides = [1, 1]} : vector<8x128xf32> to vector<8x2xf32>
    %cst_8 = arith.constant dense<0xFF800000> : vector<8xf32>
    %24 = vector.multi_reduction <maximumf>, %23, %cst_8 [1] : vector<8x2xf32> to vector<8xf32>
    %25 = vector.shape_cast %24 : vector<8xf32> to vector<8x1xf32>
    %26 = vector.broadcast %25 : vector<8x1xf32> to vector<8x2xf32>
    %27 = arith.subf %23, %26 : vector<8x2xf32>
    %28 = math.exp %27 : vector<8x2xf32>
    %cst_9 = arith.constant dense<0.000000e+00> : vector<8xf32>
    %29 = vector.multi_reduction <add>, %28, %cst_9 [1] : vector<8x2xf32> to vector<8xf32>
    %30 = vector.shape_cast %29 : vector<8xf32> to vector<8x1xf32>
    %31 = tpu.reciprocal %30 {approx = true} : vector<8x1xf32> -> vector<8x1xf32>
    %32 = vector.broadcast %31 : vector<8x1xf32> to vector<8x2xf32>
    %33 = arith.mulf %28, %32 : vector<8x2xf32>
    %34 = vector.extract_strided_slice %33 {offsets = [0, 0], sizes = [8, 1], strides = [1, 1]} : vector<8x2xf32> to vector<8x1xf32>
    %35 = vector.extract_strided_slice %33 {offsets = [0, 1], sizes = [8, 1], strides = [1, 1]} : vector<8x2xf32> to vector<8x1xf32>
    %c0_10 = arith.constant 0 : index
    %c0_11 = arith.constant 0 : index
    %36 = vector.load %arg4[%c0_10, %c0_11] : memref<128x128xf32, #tpu.memory_space<vmem>>, vector<128x128xf32>
    %cst_12 = arith.constant dense<0.000000e+00> : vector<8x128xf32>
    %37 = tpu.matmul %22, %36, %cst_12 {dimension_numbers = #tpu.dot_dimension_numbers<[1], [0], [0], [1], [0, 0, 1, 1], [], []>} : vector<8x128xf32>, vector<128x128xf32>, vector<8x128xf32> -> vector<8x128xf32>
    %38 = vector.broadcast %35 : vector<8x1xf32> to vector<8x128xf32>
    %39 = arith.mulf %37, %38 : vector<8x128xf32>
    %40 = vector.broadcast %34 : vector<8x1xf32> to vector<8x128xf32>
    %41 = arith.mulf %22, %40 : vector<8x128xf32>
    %42 = arith.addf %41, %39 : vector<8x128xf32>
    %c0_13 = arith.constant 0 : index
    %c0_14 = arith.constant 0 : index
    %43 = vector.load %arg5[%c0_13, %c0_14] : memref<8x128xf32, #tpu.memory_space<vmem>>, vector<8x128xf32>
    tpu.vector_store %arg5[%c0_13, %c0_14], %42 {strides = array<i32>} : memref<8x128xf32, #tpu.memory_space<vmem>>, vector<8x128xf32>,
    return
  }
  func.func @transform_0(%arg0: i32) -> (i32, i32) {
    %c0_i32 = arith.constant 0 : i32
    %c0_i32_0 = arith.constant 0 : i32
    return %arg0, %c0_i32 : i32, i32
  }
  func.func @transform_1(%arg0: i32) -> (i32, i32) {
    %c0_i32 = arith.constant 0 : i32
    %c0_i32_0 = arith.constant 0 : i32
    %c0_i32_1 = arith.constant 0 : i32
    return %c0_i32, %c0_i32_0 : i32, i32
  }
  func.func @transform_2(%arg0: i32) -> (i32, i32) {
    %c0_i32 = arith.constant 0 : i32
    %c0_i32_0 = arith.constant 0 : i32
    %c0_i32_1 = arith.constant 0 : i32
    return %c0_i32, %c0_i32_0 : i32, i32
  }
  func.func @transform_3(%arg0: i32) -> (i32, i32) {
    %c0_i32 = arith.constant 0 : i32
    %c0_i32_0 = arith.constant 0 : i32
    %c0_i32_1 = arith.constant 0 : i32
    return %c0_i32, %c0_i32_0 : i32, i32
  }
  func.func @transform_4(%arg0: i32) -> (i32, i32) {
    %c0_i32 = arith.constant 0 : i32
    %c0_i32_0 = arith.constant 0 : i32
    return %arg0, %c0_i32 : i32, i32
  }
}

</mosaic_0001>

<bundles_post_ra>
// kernel: tpu_custom_call.1
= control target key start
LH: loop header
LB: loop body
LE: loop exit
PB: predicated region body
PF: predicated region fallthrough
CT: control target
= control target key end

     0   :  { %9 = vsyncpa [#allocation3], 0  ;;  %s1434_s0 = inlined_call_operand.hbm [shape: bf16[8,1024], index: 0, kind: input, shape index: {}]   ;;  %s1435_s1 = inlined_call_operand.hbm [shape: bf16[1024,128], index: 1, kind: input, shape index: {}]   ;;  %s1436_s2 = inlined_call_operand.vmem [shape: f32[1,128], index: 2, kind: input, shape index: {}]   ;;  %s1437_s3 = inlined_call_operand.hbm [shape: f32[128,128], index: 3, kind: input, shape index: {}]   ;;  %s1438_s4 = inlined_call_operand.hbm [shape: f32[8,128], index: 4, kind: output, shape index: {}]  }
   0x1   :  { %10 = vsyncpa [#allocation6], 0 }
   0x2   :  { %11 = vsyncpa [#allocation4], 0  ;;  %s1344_s15 = smov [#allocation5]   ;;  %s1250_s19 = scalar_lea.hbm %s1435_s1, 8192 }
   0x3   :  { %s27_s16 = sshll.u32 %s1344_s15, 4  ;;  %p1251_p0 = scmp.ne.s32.totalorder %s1435_s1, %s1250_s19  ;;  %s28_s16 = int_to_ptr.vmem [resolvable:$true] %s27_s16 }
   0x4   :  { %p1254_p1 = scmp.lt.u32.totalorder %s1250_s19, %s1435_s1 }
   0x6   :  { %p1256_p2 = pnand %p1254_p1, %p1251_p0 }
   0x8   :  { %1259 = shalt.err (!%p1256_p2)
}
   0x9   :  { %s1260_s24 = scalar_lea.vmem %s28_s16, 8192  ;;  %p1265_p4 = scmp.lt.s32.totalorder %s28_s16, %s28_s16 }
   0xa   :  { %p1261_p3 = scmp.ne.s32.totalorder %s28_s16, %s1260_s24  ;;  %p1266_p5 = scmp.lt.s32.totalorder %s1260_s24, %s1260_s24 }
   0xc   :  { %p1267_p6 = por %p1266_p5, %p1265_p4 }
   0xe   :  { %p1268_p7 = pnand %p1267_p6, %p1261_p3 }
  0x10   :  { %1271 = shalt.err (!%p1268_p7)
}
  0x11   :  { %s1345_s25 = smov 64   ;;  %s1346_s26 = smov 4  }
  0x12   :  { %33 = dma.hbm_to_vmem [thread:$0]  %s1435_s1, 8192, %s28_s16, [#allocation6], %s1345_s25, %s1345_s25, %s1346_s26  }
  0x13   :  { %s1347_s29 = smov [#allocation2]   ;;  %s1348_s5 = smov [#allocation7]  }
  0x14   :  { %s18_s30 = sshll.u32 %s1347_s29, 4  ;;  %s41_s6 = sshll.u32 %s1348_s5, 4  ;;  %s19_s30 = int_to_ptr.vmem [resolvable:$true] %s18_s30  ;;  %s42_s6 = int_to_ptr.vmem [resolvable:$true] %s41_s6 }
  0x15   :  { %s1272_s9 = scalar_lea.hbm %s1434_s0, 512 }
  0x16   :  { %p1273_p8 = scmp.ne.s32.totalorder %s1434_s0, %s1272_s9  ;;  %p1276_p9 = scmp.lt.u32.totalorder %s1272_s9, %s1434_s0 }
  0x18   :  { %p1278_p10 = pnand %p1276_p9, %p1273_p8 }
  0x1a   :  { %1281 = shalt.err (!%p1278_p10)
}
  0x1b   :  { %s1282_s1 = scalar_lea.vmem %s19_s30, 512  ;;  %p1287_p12 = scmp.lt.s32.totalorder %s19_s30, %s19_s30 }
  0x1c   :  { %p1283_p11 = scmp.ne.s32.totalorder %s19_s30, %s1282_s1  ;;  %p1288_p13 = scmp.lt.s32.totalorder %s1282_s1, %s1282_s1 }
  0x1e   :  { %p1289_p0 = por %p1288_p13, %p1287_p12 }
  0x20   :  { %p1290_p1 = pnand %p1289_p0, %p1283_p11 }
  0x22   :  { %1293 = shalt.err (!%p1290_p1)
}
  0x23   :  { %21 = dma.hbm_to_vmem [thread:$0]  %s1434_s0, 512, %s19_s30, [#allocation3]  }
  0x24   :  { %s1294_s18 = scalar_lea.hbm %s1437_s3, 2048 }
  0x25   :  { %p1295_p2 = scmp.ne.s32.totalorder %s1437_s3, %s1294_s18  ;;  %p1298_p3 = scmp.lt.u32.totalorder %s1294_s18, %s1437_s3 }
  0x27   :  { %p1300_p4 = pnand %p1298_p3, %p1295_p2 }
  0x29   :  { %1303 = shalt.err (!%p1300_p4)
}
  0x2a   :  { %s1304_s23 = scalar_lea.vmem %s42_s6, 2048  ;;  %p1309_p6 = scmp.lt.s32.totalorder %s42_s6, %s42_s6 }
  0x2b   :  { %p1305_p5 = scmp.ne.s32.totalorder %s42_s6, %s1304_s23  ;;  %p1310_p7 = scmp.lt.s32.totalorder %s1304_s23, %s1304_s23 }
  0x2d   :  { %p1311_p8 = por %p1310_p7, %p1309_p6 }
  0x2f   :  { %p1312_p9 = pnand %p1311_p8, %p1305_p5 }
  0x31   :  { %1315 = shalt.err (!%p1312_p9)
}
  0x32   :  { %s1349_s0 = smov 128   ;;  %s1350_s24 = smov 8  }
  0x33   :  { %47 = dma.hbm_to_vmem [thread:$0]  %s1437_s3, 2048, %s42_s6, [#allocation6], %s1349_s0, %s1349_s0, %s1350_s24  }
  0x34   :  { %1338 = dma.done.wait [#allocation3], 512  }
  0x35   :  { %1339 = vsyncadd [#allocation3], 4294966784 }
  0x36   :  { %1340 = dma.done.wait [#allocation6], 10240  }
  0x37   :  { %1341 = vsyncadd [#allocation6], 4294957056  ;;  %v1170_v0 = vld [vmem:[#allocation5 + $0x40] sm:$0xff]   ;;  %v1174_v4 = vld [vmem:[#allocation5 + $0x48] sm:$0xff]   ;;  %vm784_vm0 = vcmask 97360   ;;  %vm1353_vm2 = vmmov 0  }
  0x38   :  { %v1171_v1 = vld [vmem:[#allocation5 + $0xc0] sm:$0xff]   ;;  %989 = vmatprep.subr.bf16.mxu0 %v1170_v0  ;;  %v1175_v5 = vld [vmem:[#allocation5 + $0xc8] sm:$0xff]   ;;  %v1178_v8 = vld [vmem:[#allocation5 + $0x50] sm:$0xff]   ;;  %vm795_vm3 = vcmask 15360   ;;  %s1357_s28 = smov [#allocation8]  }
  0x39   :  { %v1172_v2 = vld [vmem:[#allocation5] sm:$0xff]   ;;  %1011 = vmatprep.subr.bf16.mxu1 %v1171_v1  ;;  %v1176_v6 = vld [vmem:[#allocation5 + $0x8] sm:$0xff]   ;;  %v1179_v9 = vld [vmem:[#allocation5 + $0xd0] sm:$0xff]   ;;  %s906_s29 = sshll.u32 %s1357_s28, 4  ;;  %s907_s29 = int_to_ptr.vmem [resolvable:$true] %s906_s29 }
  0x3a   :  { %v1173_v3 = vld [vmem:[#allocation5 + $0x80] sm:$0xff]   ;;  %990 = vmatpush3.bf16.msra.mxu0 %v1172_v2  ;;  %v1177_v7 = vld [vmem:[#allocation5 + $0x88] sm:$0xff]   ;;  %v1180_v10 = vld [vmem:[#allocation5 + $0x10] sm:$0xff]   ;;  %s1316_s30 = scalar_lea.vmem %s907_s29, 128  ;;  %p1321_p11 = scmp.lt.s32.totalorder %s907_s29, %s907_s29 }
  0x3b   :  { %1012 = vmatpush3.bf16.msra.mxu1 %v1173_v3  ;;  %991 = vmatprep.subr.bf16.mxu0 %v1174_v4  ;;  %v1181_v11 = vld [vmem:[#allocation5 + $0x90] sm:$0xff]   ;;  %v1182_v12 = vld [vmem:[#allocation5 + $0x58] sm:$0xff]   ;;  %v1186_v16 = vld [vmem:[#allocation5 + $0x60] sm:$0xff]   ;;  %p1317_p10 = scmp.ne.s32.totalorder %s907_s29, %s1316_s30  ;;  %p1322_p12 = scmp.lt.s32.totalorder %s1316_s30, %s1316_s30 }
  0x3c   :  { %1013 = vmatprep.subr.bf16.mxu1 %v1175_v5  ;;  %v1183_v13 = vld [vmem:[#allocation5 + $0xd8] sm:$0xff]   ;;  %v1187_v17 = vld [vmem:[#allocation5 + $0xe0] sm:$0xff]   ;;  %v1190_v20 = vld [vmem:[#allocation5 + $0x68] sm:$0xff]  }
  0x3d   :  { %v1184_v14 = vld [vmem:[#allocation5 + $0x18] sm:$0xff]   ;;  %v1188_v18 = vld [vmem:[#allocation5 + $0x20] sm:$0xff]   ;;  %v1191_v21 = vld [vmem:[#allocation5 + $0xe8] sm:$0xff]   ;;  %p1323_p13 = por %p1322_p12, %p1321_p11 }
  0x3e   :  { %992 = vmatpush3.bf16.msra.mxu0 %v1176_v6  ;;  %v1185_v15 = vld [vmem:[#allocation5 + $0x98] sm:$0xff]   ;;  %v1189_v19 = vld [vmem:[#allocation5 + $0xa0] sm:$0xff]   ;;  %v1192_v22 = vld [vmem:[#allocation5 + $0x28] sm:$0xff]  }
  0x3f   :  { %1014 = vmatpush3.bf16.msra.mxu1 %v1177_v7  ;;  %993 = vmatprep.subr.bf16.mxu0 %v1178_v8  ;;  %v1193_v23 = vld [vmem:[#allocation5 + $0xa8] sm:$0xff]   ;;  %v1194_v24 = vld [vmem:[#allocation5 + $0x70] sm:$0xff]   ;;  %v1198_v28 = vld [vmem:[#allocation5 + $0x78] sm:$0xff]   ;;  %p1324_p0 = pnand %p1323_p13, %p1317_p10 }
  0x40   :  { %1015 = vmatprep.subr.bf16.mxu1 %v1179_v9  ;;  %v1195_v25 = vld [vmem:[#allocation5 + $0xf0] sm:$0xff]   ;;  %v1199_v29 = vld [vmem:[#allocation5 + $0xf8] sm:$0xff]   ;;  %v58_v32 = vld [vmem:[#allocation2] sm:$0xff] }
  0x41   :  { %v1196_v26 = vld [vmem:[#allocation5 + $0x30] sm:$0xff]   ;;  %v1200_v30 = vld [vmem:[#allocation5 + $0x38] sm:$0xff]   ;;  %v59_v33 = vld [vmem:[#allocation2 + $0x8] sm:$0xff]  ;;  %v917_v34 = vcombine.low %v58_v32, %v58_v32  ;;  %v918_v35 = vcombine.high %v58_v32, %v58_v32 }
  0x42   :  { %994 = vmatpush3.bf16.msra.mxu0 %v1180_v10  ;;  %v1197_v27 = vld [vmem:[#allocation5 + $0xb0] sm:$0xff]   ;;  %v1201_v31 = vld [vmem:[#allocation5 + $0xb8] sm:$0xff]   ;;  %v919_v36 = vcombine.low %v59_v33, %v59_v33  ;;  %v920_v37 = vcombine.high %v59_v33, %v59_v33  ;;  %v1206_v38 = vld [vmem:[#allocation5 + $0x140] sm:$0xff]  }
  0x43   :  { %1016 = vmatpush3.bf16.msra.mxu1 %v1181_v11  ;;  %995 = vmatprep.subr.bf16.mxu0 %v1182_v12  ;;  %v1207_v39 = vld [vmem:[#allocation5 + $0x1c0] sm:$0xff]   ;;  %v1210_v42 = vld [vmem:[#allocation5 + $0x148] sm:$0xff]   ;;  %v1214_v46 = vld [vmem:[#allocation5 + $0x150] sm:$0xff]  }
  0x44   :  { %1017 = vmatprep.subr.bf16.mxu1 %v1183_v13  ;;  %641 = vmatprep.mubr.bf16.mxu0 %v918_v35  ;;  %v1208_v40 = vld [vmem:[#allocation5 + $0x100] sm:$0xff]   ;;  %v1211_v43 = vld [vmem:[#allocation5 + $0x1c8] sm:$0xff]   ;;  %v1215_v47 = vld [vmem:[#allocation5 + $0x1d0] sm:$0xff]  }
  0x45   :  { %681 = vmatprep.mubr.bf16.mxu1 %v920_v37  ;;  %v1209_v41 = vld [vmem:[#allocation5 + $0x180] sm:$0xff]   ;;  %v1212_v44 = vld [vmem:[#allocation5 + $0x108] sm:$0xff]   ;;  %v1216_v48 = vld [vmem:[#allocation5 + $0x110] sm:$0xff]  }
  0x46   :  { %996 = vmatpush3.bf16.msra.mxu0 %v1184_v14  ;;  %v1213_v45 = vld [vmem:[#allocation5 + $0x188] sm:$0xff]   ;;  %v1217_v49 = vld [vmem:[#allocation5 + $0x190] sm:$0xff]   ;;  %v1218_v50 = vld [vmem:[#allocation5 + $0x158] sm:$0xff]  }
  0x47   :  { %1018 = vmatpush3.bf16.msra.mxu1 %v1185_v15  ;;  %997 = vmatprep.subr.bf16.mxu0 %v1186_v16  ;;  %v1219_v51 = vld [vmem:[#allocation5 + $0x1d8] sm:$0xff]   ;;  %v1222_v54 = vld [vmem:[#allocation5 + $0x160] sm:$0xff]   ;;  %v1226_v58 = vld [vmem:[#allocation5 + $0x168] sm:$0xff]  }
  0x48   :  { %1019 = vmatprep.subr.bf16.mxu1 %v1187_v17  ;;  %v1220_v52 = vld [vmem:[#allocation5 + $0x118] sm:$0xff]   ;;  %v1223_v55 = vld [vmem:[#allocation5 + $0x1e0] sm:$0xff]   ;;  %v1227_v59 = vld [vmem:[#allocation5 + $0x1e8] sm:$0xff]  }
  0x49   :  { %v1221_v53 = vld [vmem:[#allocation5 + $0x198] sm:$0xff]   ;;  %v1224_v56 = vld [vmem:[#allocation5 + $0x120] sm:$0xff]   ;;  %v1228_v60 = vld [vmem:[#allocation5 + $0x128] sm:$0xff]  }
  0x4a   :  { %998 = vmatpush3.bf16.msra.mxu0 %v1188_v18  ;;  %v1225_v57 = vld [vmem:[#allocation5 + $0x1a0] sm:$0xff]   ;;  %v1229_v61 = vld [vmem:[#allocation5 + $0x1a8] sm:$0xff]   ;;  %v1230_v62 = vld [vmem:[#allocation5 + $0x170] sm:$0xff]  }
  0x4b   :  { %1020 = vmatpush3.bf16.msra.mxu1 %v1189_v19  ;;  %999 = vmatprep.subr.bf16.mxu0 %v1190_v20  ;;  %v1231_v63 = vld [vmem:[#allocation5 + $0x1f0] sm:$0xff]   ;;  %v1234_v2 = vld [vmem:[#allocation5 + $0x178] sm:$0xff]   ;;  %v916_v14 = vld [vmem:[%s1436_s2] ss:$0 sm:$0xff]  ;;  %s1352_s2 = smov 118  }
  0x4c   :  { %1021 = vmatprep.subr.bf16.mxu1 %v1191_v21  ;;  %v1232_v0 = vld [vmem:[#allocation5 + $0x130] sm:$0xff]   ;;  %v1235_v3 = vld [vmem:[#allocation5 + $0x1f8] sm:$0xff]  }
  0x4d   :  { %v1233_v1 = vld [vmem:[#allocation5 + $0x1b0] sm:$0xff]   ;;  %v1236_v4 = vld [vmem:[#allocation5 + $0x138] sm:$0xff]  }
  0x4e   :  { %1000 = vmatpush3.bf16.msra.mxu0 %v1192_v22  ;;  %v1237_v5 = vld [vmem:[#allocation5 + $0x1b8] sm:$0xff]   ;;  %v60_v6 = vld [vmem:[#allocation2 + $0x10] sm:$0xff] }
  0x4f   :  { %1022 = vmatpush3.bf16.msra.mxu1 %v1193_v23  ;;  %1001 = vmatprep.subr.bf16.mxu0 %v1194_v24  ;;  %v921_v7 = vcombine.low %v60_v6, %v60_v6  ;;  %v922_v8 = vcombine.high %v60_v6, %v60_v6  ;;  %v61_v9 = vld [vmem:[#allocation2 + $0x18] sm:$0xff]  ;;  %v1354_v6 = vmov 0.0  }
  0x50   :  { %1023 = vmatprep.subr.bf16.mxu1 %v1195_v25  ;;  %v923_v10 = vcombine.low %v61_v9, %v61_v9  ;;  %v924_v11 = vcombine.high %v61_v9, %v61_v9  ;;  %v769_v25 = vlaneseq  ;;  %v816_v9 = vld [vmem:[#allocation7 + $0x78] sm:$0xff] }
  0x52   :  { %1002 = vmatpush3.bf16.msra.mxu0 %v1196_v26 }
  0x53   :  { %1024 = vmatpush3.bf16.msra.mxu1 %v1197_v27  ;;  %1003 = vmatprep.subr.bf16.mxu0 %v1198_v28 }
  0x54   :  { %1025 = vmatprep.subr.bf16.mxu1 %v1199_v29 }
  0x56   :  { %1004 = vmatpush3.bf16.msra.mxu0 %v1200_v30  ;;  %v770_v30 = vand.u32 127, %v769_v25 }
  0x57   :  { %1026 = vmatpush3.bf16.msra.mxu1 %v1201_v31  ;;  %1033 = vmatprep.subr.bf16.mxu0 %v1206_v38 }
  0x58   :  { %1055 = vmatprep.subr.bf16.mxu1 %v1207_v39  ;;  %vm771_vm1 = vcmp.lt.s32.totalorder %v770_v30, 10 }
  0x59   :  { %642 = vmatmul.mubr.bf16.vlgmr.msra.gmra.mrb[0].mxu0 %v917_v34 }
  0x5a   :  { %682 = vmatmul.mubr.bf16.vlgmr.msra.gmra.mrb[0].mxu1 %v919_v36  ;;  %1034 = vmatpush3.bf16.msra.mxu0 %v1208_v40 }
  0x5b   :  { %1056 = vmatpush3.bf16.msra.mxu1 %v1209_v41  ;;  %1035 = vmatprep.subr.bf16.mxu0 %v1210_v42 }
  0x5c   :  { %1057 = vmatprep.subr.bf16.mxu1 %v1211_v43  ;;  %721 = vmatprep.mubr.bf16.mxu0 %v922_v8  ;;  %v815_v8 = vld [vmem:[#allocation7 + $0x70] sm:$0xff] }
  0x5d   :  { %761 = vmatprep.mubr.bf16.mxu1 %v924_v11 }
  0x5e   :  { %1036 = vmatpush3.bf16.msra.mxu0 %v1212_v44 }
  0x5f   :  { %1058 = vmatpush3.bf16.msra.mxu1 %v1213_v45  ;;  %1037 = vmatprep.subr.bf16.mxu0 %v1214_v46 }
  0x60   :  { %1059 = vmatprep.subr.bf16.mxu1 %v1215_v47  ;;  %v801_v47 = vld [vmem:[#allocation7] sm:$0xff] }
  0x62   :  { %1038 = vmatpush3.bf16.msra.mxu0 %v1216_v48  ;;  %v802_v48 = vld [vmem:[#allocation7 + $0x8] sm:$0xff] }
  0x63   :  { %1060 = vmatpush3.bf16.msra.mxu1 %v1217_v49  ;;  %1039 = vmatprep.subr.bf16.mxu0 %v1218_v50  ;;  %v803_v49 = vld [vmem:[#allocation7 + $0x10] sm:$0xff]  ;;  %v1351_v50 = vmov 0.0|0.0  }
  0x64   :  { %1061 = vmatprep.subr.bf16.mxu1 %v1219_v51  ;;  %v1130_v51 = vpack.c.bf16 %v802_v48, %v801_v47 }
  0x66   :  { %1040 = vmatpush3.bf16.msra.mxu0 %v1220_v52  ;;  %v804_v52 = vld [vmem:[#allocation7 + $0x18] sm:$0xff] }
  0x67   :  { %1062 = vmatpush3.bf16.msra.mxu1 %v1221_v53  ;;  %1041 = vmatprep.subr.bf16.mxu0 %v1222_v54  ;;  %v1133_v53 = vpack.c.bf16 %v804_v52, %v803_v49  ;;  %v805_v54 = vld [vmem:[#allocation7 + $0x20] sm:$0xff] }
  0x68   :  { %1063 = vmatprep.subr.bf16.mxu1 %v1223_v55  ;;  %v806_v55 = vld [vmem:[#allocation7 + $0x28] sm:$0xff] }
  0x6a   :  { %1042 = vmatpush3.bf16.msra.mxu0 %v1224_v56  ;;  %v1136_v56 = vpack.c.bf16 %v806_v55, %v805_v54 }
  0x6b   :  { %1064 = vmatpush3.bf16.msra.mxu1 %v1225_v57  ;;  %1043 = vmatprep.subr.bf16.mxu0 %v1226_v58  ;;  %v807_v57 = vld [vmem:[#allocation7 + $0x30] sm:$0xff]  ;;  %v808_v58 = vld [vmem:[#allocation7 + $0x38] sm:$0xff] }
  0x6c   :  { %1065 = vmatprep.subr.bf16.mxu1 %v1227_v59 }
  0x6e   :  { %1044 = vmatpush3.bf16.msra.mxu0 %v1228_v60  ;;  %v1139_v60 = vpack.c.bf16 %v808_v58, %v807_v57 }
  0x6f   :  { %1066 = vmatpush3.bf16.msra.mxu1 %v1229_v61  ;;  %1045 = vmatprep.subr.bf16.mxu0 %v1230_v62  ;;  %v809_v62 = vld [vmem:[#allocation7 + $0x40] sm:$0xff] }
  0x70   :  { %1067 = vmatprep.subr.bf16.mxu1 %v1231_v63  ;;  %v810_v63 = vld [vmem:[#allocation7 + $0x48] sm:$0xff] }
  0x72   :  { %1046 = vmatpush3.bf16.msra.mxu0 %v1232_v0  ;;  %v1142_v0 = vpack.c.bf16 %v810_v63, %v809_v62 }
  0x73   :  { %1068 = vmatpush3.bf16.msra.mxu1 %v1233_v1  ;;  %1047 = vmatprep.subr.bf16.mxu0 %v1234_v2  ;;  %v811_v1 = vld [vmem:[#allocation7 + $0x50] sm:$0xff]  ;;  %v812_v2 = vld [vmem:[#allocation7 + $0x58] sm:$0xff] }
  0x74   :  { %1069 = vmatprep.subr.bf16.mxu1 %v1235_v3  ;;  %v1145_v3 = vpack.c.bf16 %v812_v2, %v811_v1 }
  0x76   :  { %1048 = vmatpush3.bf16.msra.mxu0 %v1236_v4  ;;  %v813_v4 = vld [vmem:[#allocation7 + $0x60] sm:$0xff] }
  0x77   :  { %1070 = vmatpush3.bf16.msra.mxu1 %v1237_v5  ;;  %1129 = vmatprep.subr.bf16.mxu0 %v1351_v50  ;;  %v814_v5 = vld [vmem:[#allocation7 + $0x68] sm:$0xff] }
  0x79   :  { %722 = vmatmul.mubr.bf16.vlgmr.msra.gmra.mrb[4].mxu0 %v921_v7  ;;  %v1148_v7 = vpack.c.bf16 %v814_v5, %v813_v4 }
  0x7a   :  { %762 = vmatmul.mubr.bf16.vlgmr.msra.gmra.mrb[4].mxu1 %v923_v10  ;;  %1131 = vmatpush3.bf16.msra.mxu0 %v1130_v51  ;;  %v1151_v10 = vpack.c.bf16 %v816_v9, %v815_v8 }
  0x7b   :  { %1132 = vmatprep.subr.bf16.mxu0 %v1351_v50  ;;  %1126 = vmatprep.mubr.msk.f32.mxu0 %vm1353_vm2, %v1354_v6 }
  0x7e   :  { %1134 = vmatpush3.bf16.msra.mxu0 %v1133_v53 }
  0x7f   :  { %1135 = vmatprep.subr.bf16.mxu0 %v1351_v50 }
  0x82   :  { %1137 = vmatpush3.bf16.msra.mxu0 %v1136_v56 }
  0x83   :  { %1138 = vmatprep.subr.bf16.mxu0 %v1351_v50 }
  0x86   :  { %1140 = vmatpush3.bf16.msra.mxu0 %v1139_v60 }
  0x87   :  { %1141 = vmatprep.subr.bf16.mxu0 %v1351_v50 }
  0x8a   :  { %1143 = vmatpush3.bf16.msra.mxu0 %v1142_v0 }
  0x8b   :  { %1144 = vmatprep.subr.bf16.mxu0 %v1351_v50 }
  0x8e   :  { %1146 = vmatpush3.bf16.msra.mxu0 %v1145_v3 }
  0x8f   :  { %1147 = vmatprep.subr.bf16.mxu0 %v1351_v50 }
  0x92   :  { %1149 = vmatpush3.bf16.msra.mxu0 %v1148_v7 }
  0x93   :  { %1150 = vmatprep.subr.bf16.mxu0 %v1351_v50 }
  0x96   :  { %1152 = vmatpush3.bf16.msra.mxu0 %v1151_v10 }
 0x12c   :  { %v1005_v12 = vpop.f32.mrb[0].mxu0 }
 0x12d   :  { %v1027_v13 = vpop.f32.mrb[0].mxu1  ;;  %v1006_v15 = vpop.f32.mrb[1].mxu0 }
 0x12e   :  { %v1028_v16 = vpop.f32.mrb[1].mxu1  ;;  %v1007_v17 = vadd.f32 %v1006_v15, %v1005_v12  ;;  %v1008_v19 = vpop.f32.mrb[2].mxu0 }
 0x12f   :  { %v1029_v18 = vadd.f32 %v1028_v16, %v1027_v13  ;;  %v1030_v20 = vpop.f32.mrb[2].mxu1  ;;  %v1009_v21 = vpop.f32.mrb[3].mxu0  ;;  %v1355_v13 = vmov 10  }
 0x130   :  { %v1031_v22 = vpop.f32.mrb[3].mxu1  ;;  %v644_v23 = vadd.f32 %v1007_v17, %v916_v14  ;;  %1168 = vset.pattern.permute.xlu1 %v1355_v13  ;;  %v1356_v14 = vmov 11  }
 0x131   :  { %1167 = vset.pattern.permute.xlu0 %v1356_v14 }
 0x132   :  { %v684_v24 = vadd.f32 %v1029_v18, %v644_v23 }
 0x14c   :  { %v1049_v26 = vpop.f32.mrb[4].mxu0 }
 0x14d   :  { %v1071_v27 = vpop.f32.mrb[4].mxu1  ;;  %v1050_v28 = vpop.f32.mrb[5].mxu0 }
 0x14e   :  { %v1072_v29 = vpop.f32.mrb[5].mxu1  ;;  %v1051_v31 = vadd.f32 %v1050_v28, %v1049_v26  ;;  %v1052_v33 = vpop.f32.mrb[6].mxu0 }
 0x14f   :  { %v1073_v32 = vadd.f32 %v1072_v29, %v1071_v27  ;;  %v1074_v34 = vpop.f32.mrb[6].mxu1  ;;  %v1053_v35 = vpop.f32.mrb[7].mxu0 }
 0x150   :  { %v1075_v36 = vpop.f32.mrb[7].mxu1  ;;  %v724_v37 = vadd.f32 %v1051_v31, %v684_v24 }
 0x152   :  { %v764_v38 = vadd.f32 %v1073_v32, %v724_v37 }
 0x154   :  { %v785_v39 = vsel %vm784_vm0, %v764_v38, -inf  ;;  %v774_v40 = vsel %vm771_vm1, %v764_v38, -1e+30 }
 0x155   :  { %786 = vmax.xlane.f32.xlu1 %v785_v39  ;;  %775 = vmax.xlane.f32.xlu0 %v774_v40 }
 0x1e2   :  { %v787_v41 = vpop.xlane.xlu1 %786  ;;  %v776_v42 = vpop.xlane.xlu0 %775 }
 0x1e3   :  { %v788_v43 = vsub.f32 %v764_v38, %v787_v41  ;;  %v777_v44 = vsub.f32 %v774_v40, %v776_v42 }
 0x1e5   :  { %v789_v45 = vmul.f32 1.442695, %v788_v43  ;;  %v778_v46 = vmul.f32 1.442695, %v777_v44 }
 0x1e7   :  { %1242 = vpow2.f32 %v789_v45 }
 0x1e8   :  { %1244 = vpow2.f32 %v778_v46 }
 0x1f1   :  { %v1243_v59 = vpop.eup %1242 }
 0x1f2   :  { %v1245_v61 = vpop.eup %1244  ;;  %792 = vrot.lane.b32.xlu1 %v1243_v59, %s1352_s2 }
 0x1f3   :  { %780 = vadd.xlane.f32.xlu0 %v1245_v61 }
 0x264   :  { %v793_v11 = vpop.permute.xlu1 %792 }
 0x265   :  { %v796_v12 = vsel %vm795_vm3, %v793_v11, 0.0 }
 0x266   :  { %797 = vadd.xlane.f32.xlu0 %v796_v12 }
 0x280   :  { %v781_v15 = vpop.xlane.xlu0 %780 }
 0x281   :  { %1246 = vrcp.f32 %v781_v15 }
 0x28b   :  { %v1247_v16 = vpop.eup %1246 }
 0x28c   :  { %v783_v17 = vmul.f32 %v1247_v16, %v1245_v61 }
 0x28e   :  { %1127 = vmatmul.mubr.f32.vlgmr.msra.gmra.mrb[8].mxu0 %v783_v17 }
 0x2f3   :  { %v798_v18 = vpop.xlane.xlu0 %797 }
 0x2f4   :  { %1248 = vrcp.f32 %v798_v18 }
 0x2fe   :  { %v1249_v19 = vpop.eup %1248 }
 0x2ff   :  { %v800_v20 = vmul.f32 %v1249_v19, %v1243_v59 }
 0x301   :  { %894 = vperm.xlu1 %1168, %v800_v20   ;;  %889 = vperm.xlu0 %1167, %v800_v20  }
 0x305   :  { %1169 = vset.pattern.permute.xlu0 %v1355_v13 }
 0x361   :  { %v883_v21 = vpop.f32.mrb[8].mxu0 }
 0x362   :  { %v1128_v22 = vpop.f32.mrb[9].mxu0 }
 0x380   :  { %v895_v23 = vpop.permute.xlu1 %894  ;;  %v890_v24 = vpop.permute.xlu0 %889 }
 0x381   :  { %v897_v25 = vmul.f32 %v895_v23, %v783_v17  ;;  %v892_v26 = vmul.f32 %v890_v24, %v883_v21 }
 0x383   :  { %v898_v27 = vadd.f32 %v897_v25, %v892_v26 }
 0x385   :  { %899 = vst [vmem:[#allocation8] sm:$0xff] %v898_v27 }
 0x386   :  { %1327 = shalt.err (!%p1324_p0)
}
 0x387   :  { %s1328_s7 = scalar_lea.hbm %s1438_s4, 128 }
 0x388   :  { %p1329_p1 = scmp.ne.s32.totalorder %s1438_s4, %s1328_s7  ;;  %p1332_p2 = scmp.lt.u32.totalorder %s1328_s7, %s1438_s4 }
 0x38a   :  { %p1334_p3 = pnand %p1332_p2, %p1329_p1 }
 0x38c   :  { %1337 = shalt.err (!%p1334_p3)
}
 0x38d   :  { %909 = dma.vmem_to_hbm [thread:$0]  %s907_s29, 128, %s1438_s4, [#allocation4]  }
 0x38e   :  { %1342 = dma.done.wait [#allocation4], 128  }
 0x38f   :  { %1343 = vsyncadd [#allocation4], 4294967168 }
 0x390   :  { %913 = vsyncpa [#allocation3], 1 }
 0x391   :  { %914 = vsyncpa [#allocation6], 1 }
 0x392   :  { %915 = vsyncpa [#allocation4], 1 }

</bundles_post_ra>
